<compile_context>
chip_gen: v6e
topology: v6e:2x2x1
jax: 0.10.0
libtpu: 0.0.40
codegen_flags: <defaults>
</compile_context>

<pallas_src>
import jax
import jax.numpy as jnp
from jax.experimental import pallas as pl
from jax.experimental.pallas import tpu as pltpu
import numpy as np


def probe_kernel(x_ref, w_ref, b_ref, o_ref):
    # x_ref: [tb, D]  batch tile (streamed / double-buffered over the grid)
    # w_ref: [1, D]   weight, resident in VMEM across all batch tiles
    # b_ref: [1]      bias scalar in SMEM
    # o_ref: [1, tb]  lane-dense logits row for this batch tile
    logits = jax.lax.dot_general(
        w_ref[...], x_ref[...],
        # Contract D on both operands ("NT" matmul, as in q @ k^T): result is
        # [1, tb] lane-dense, no transpose of the weight or of the x tile.
        dimension_numbers=(((1,), (1,)), ((), ())),
        preferred_element_type=jnp.float32,
    )
    o_ref[...] = (logits + b_ref[0]).astype(o_ref.dtype)


def _round_up(x, m):
    return ((x + m - 1) // m) * m


def logistic_regression_probe(x, weight, bias, *, max_tile_b=2048):
    """Pallas LogisticRegressionProbe.forward: logits = x @ W^T + b  ->  [B, 1]."""
    B, D = x.shape
    itemsize = jnp.dtype(x.dtype).itemsize

    # --- Generation-aware VMEM sizing (128 MiB on v5e/v6e, 64 MiB on v7x). ---
    try:
        vmem_cap = int(pltpu.get_tpu_info().vmem_capacity_bytes)
    except Exception:
        vmem_cap = 64 * 1024 * 1024  # v7x-safe fallback
    vmem_limit = min(int(vmem_cap * 0.8), 100 * 1024 * 1024)

    # Budget for the double-buffered x stream; leave room for the (double-
    # buffered) weight block, the output buffers and Mosaic internal scratch.
    w_bytes = 2 * D * itemsize
    x_budget = max(0, int((vmem_limit - w_bytes - (2 << 20)) * 0.9))

    # --- Batch tile size. ---
    tb = min(max_tile_b, max(1, x_budget // (2 * D * itemsize)))
    if B >= 256:
        # Prefer >= 2 grid steps so the "parallel" axis can shard across both
        # v7x TensorCores instead of serializing one giant tile on one TC.
        tb = min(tb, _round_up(-(-B // 2), 128))
    if tb >= B:
        tb = B  # single full-array tile (block == full dims, always legal)
    else:
        # Multiple of 128 -> lane-dense output blocks and a sublane-aligned
        # second-minor x block dim for f32/bf16/int8 alike.
        tb = max(128, (tb // 128) * 128)
        if tb >= B:
            tb = B
    # NOTE: for extremely wide input_dim (where even a 128-row tile busts VMEM)
    # a K-tiled accumulator grid axis would be needed; not implemented here.

    grid = (pl.cdiv(B, tb),)

    weight = weight.astype(x.dtype)               # compute dtype; f32 accumulate below
    bias_smem = bias.reshape(1).astype(jnp.float32)

    out = pl.pallas_call(
        probe_kernel,
        # Lane-dense (1, B) output; ragged last block is masked on write.
        out_shape=jax.ShapeDtypeStruct((1, B), x.dtype),
        grid_spec=pltpu.PrefetchScalarGridSpec(
            num_scalar_prefetch=0,
            grid=grid,
            in_specs=[
                # x: streamed batch tiles, double-buffered by the pipeline;
                # last tile may be ragged (OOB rows ignored).
                pl.BlockSpec((tb, D), lambda i: (i, 0)),
                # weight: same block every step -> stays resident in VMEM.
                pl.BlockSpec((1, D), lambda i: (0, 0)),
                # bias: single scalar in SMEM (no VMEM buffer / DMA stream).
                pl.BlockSpec(memory_space=pltpu.MemorySpace.SMEM),
            ],
            out_specs=pl.BlockSpec((1, tb), lambda i: (0, i)),
        ),
        compiler_params=pltpu.CompilerParams(
            # Batch tiles are independent -> shard across both TCs on v7x.
            dimension_semantics=("parallel",),
            vmem_limit_bytes=vmem_limit,
        ),
    )(x, weight, bias_smem)

    # (1, B) and (B, 1) share the same contiguous bytes -> free reshape.
    return out.reshape(B, 1)


if __name__ == "__main__":
    key = jax.random.PRNGKey(0)
    kx, kw, kb, kx2 = jax.random.split(key, 4)

    # --- Small case (shapes consistent with the module): single-tile path ---
    batch = 8
    input_dim = 32
    bound = 1.0 / np.sqrt(input_dim)
    weight = jax.random.uniform(kw, (1, input_dim), jnp.float32, -bound, bound)
    bias = jax.random.uniform(kb, (1,), jnp.float32, -bound, bound)
    x = jax.random.normal(kx, (batch, input_dim), jnp.float32)

    out = logistic_regression_probe(x, weight, bias)
    out = jax.block_until_ready(out)
    ref = x @ weight.T + bias.reshape(1, 1)
    np.testing.assert_allclose(np.asarray(out), np.asarray(ref), rtol=1e-5, atol=1e-5)
    assert out.shape == (batch, 1)

    # --- Tiled path with a ragged last tile (B not divisible by the tile) ---
    batch2, input_dim2 = 200, 128
    bound2 = 1.0 / np.sqrt(input_dim2)
    kw2, kb2 = jax.random.split(kw)
    weight2 = jax.random.uniform(kw2, (1, input_dim2), jnp.float32, -bound2, bound2)
    bias2 = jax.random.uniform(kb2, (1,), jnp.float32, -bound2, bound2)
    x2 = jax.random.normal(kx2, (batch2, input_dim2), jnp.float32)

    out2 = logistic_regression_probe(x2, weight2, bias2, max_tile_b=128)
    out2 = jax.block_until_ready(out2)
    ref2 = x2 @ weight2.T + bias2.reshape(1, 1)
    np.testing.assert_allclose(np.asarray(out2), np.asarray(ref2), rtol=1e-5, atol=1e-5)
    assert out2.shape == (batch2, 1)

    print("KERNEL_OK")
</pallas_src>

<mosaic_0001>
module attributes {stable_mosaic.version = 11 : i64} {
  func.func @probe_kernel(%arg0: i32, %arg1: memref<8x32xf32, #tpu.memory_space<vmem>>, %arg2: memref<1x32xf32, #tpu.memory_space<vmem>>, %arg3: memref<1xf32, #tpu.memory_space<smem>>, %arg4: memref<1x8xf32, #tpu.memory_space<vmem>>) attributes {dimension_semantics = [#tpu.dimension_semantics<parallel>], iteration_bounds = array<i64: 1>, scalar_prefetch = 0 : i64, scratch_operands = 0 : i64, tpu.core_type = #tpu.core_type<tc>, window_params = [{transform_indices = @transform_0, window_bounds = array<i64: 8, 32>}, {pipeline_mode = #tpu.pipeline_mode<synchronous>, transform_indices = @transform_1, window_bounds = array<i64: 1, 32>}, {transform_indices = @transform_2, window_bounds = array<i64: 1>}, {transform_indices = @transform_3, window_bounds = array<i64: 1, 8>}]} {
    %c0 = arith.constant 0 : index
    %c0_0 = arith.constant 0 : index
    %0 = vector.load %arg2[%c0, %c0_0] : memref<1x32xf32, #tpu.memory_space<vmem>>, vector<1x32xf32>
    %c0_1 = arith.constant 0 : index
    %c0_2 = arith.constant 0 : index
    %1 = vector.load %arg1[%c0_1, %c0_2] : memref<8x32xf32, #tpu.memory_space<vmem>>, vector<8x32xf32>
    %cst = arith.constant dense<0.000000e+00> : vector<1x8xf32>
    %2 = tpu.matmul %0, %1, %cst {dimension_numbers = #tpu.dot_dimension_numbers<[1], [1], [0], [0], [0, 0, 1, 0], [], []>} : vector<1x32xf32>, vector<8x32xf32>, vector<1x8xf32> -> vector<1x8xf32>
    %c0_3 = arith.constant 0 : index
    %3 = memref.load %arg3[%c0_3] : memref<1xf32, #tpu.memory_space<smem>>
    %4 = vector.broadcast %3 : f32 to vector<1x8xf32>
    %5 = arith.addf %2, %4 : vector<1x8xf32>
    %c0_4 = arith.constant 0 : index
    %c0_5 = arith.constant 0 : index
    %6 = vector.load %arg4[%c0_4, %c0_5] : memref<1x8xf32, #tpu.memory_space<vmem>>, vector<1x8xf32>
    tpu.vector_store %arg4[%c0_4, %c0_5], %5 {strides = array<i32>} : memref<1x8xf32, #tpu.memory_space<vmem>>, vector<1x8xf32>,
    return
  }
  func.func @transform_0(%arg0: i32) -> (i32, i32) {
    %c0_i32 = arith.constant 0 : i32
    %c0_i32_0 = arith.constant 0 : i32
    return %arg0, %c0_i32 : i32, i32
  }
  func.func @transform_1(%arg0: i32) -> (i32, i32) {
    %c0_i32 = arith.constant 0 : i32
    %c0_i32_0 = arith.constant 0 : i32
    %c0_i32_1 = arith.constant 0 : i32
    return %c0_i32, %c0_i32_0 : i32, i32
  }
  func.func @transform_2(%arg0: i32) -> i32 {
    %c0_i32 = arith.constant 0 : i32
    %c0_i32_0 = arith.constant 0 : i32
    return %c0_i32 : i32
  }
  func.func @transform_3(%arg0: i32) -> (i32, i32) {
    %c0_i32 = arith.constant 0 : i32
    %c0_i32_0 = arith.constant 0 : i32
    return %c0_i32, %arg0 : i32, i32
  }
}

</mosaic_0001>

<bundles_post_ra>
// kernel: tpu_custom_call.1
= control target key start
LH: loop header
LB: loop body
LE: loop exit
PB: predicated region body
PF: predicated region fallthrough
CT: control target
= control target key end

     0   :  { %9 = vsyncpa [#allocation4], 0  ;;  %s219_s0 = inlined_call_operand.hbm [shape: f32[8,32], index: 0, kind: input, shape index: {}]   ;;  %s220_s1 = inlined_call_operand.vmem [shape: f32[1,32], index: 1, kind: input, shape index: {}]   ;;  %s221_s2 = inlined_call_operand.<no memory space> [shape: f32[1], index: 2, kind: input, shape index: {}]   ;;  %s222_s3 = inlined_call_operand.hbm [shape: f32[1,8], index: 3, kind: output, shape index: {}]  }
   0x1   :  { %10 = vsyncpa [#allocation5], 0  ;;  %s183_s12 = smov [#allocation3]  }
   0x2   :  { %s17_s13 = sshll.u32 %s183_s12, 4  ;;  %s18_s13 = int_to_ptr.vmem [resolvable:$true] %s17_s13 }
   0x3   :  { %s147_s14 = scalar_lea.vmem %s18_s13, 128  ;;  %p152_p1 = scmp.lt.s32.totalorder %s18_s13, %s18_s13 }
   0x4   :  { %p148_p0 = scmp.ne.s32.totalorder %s18_s13, %s147_s14  ;;  %p153_p2 = scmp.lt.s32.totalorder %s147_s14, %s147_s14 }
   0x6   :  { %p154_p3 = por %p153_p2, %p152_p1 }
   0x8   :  { %p155_p4 = pnand %p154_p3, %p148_p0 }
   0xa   :  { %158 = shalt.err (!%p155_p4)
}
   0xb   :  { %20 = dma.hbm_to_vmem [thread:$0]  %s219_s0, 128, %s18_s13, [#allocation4]  }
   0xc   :  { %179 = dma.done.wait [#allocation4], 128  }
   0xd   :  { %180 = vsyncadd [#allocation4], 4294967168  ;;  %v184_v0 = vmov 0.0   ;;  %vm185_vm0 = vmmov 0   ;;  %vm32_vm1 = vcmask 261120   ;;  %v29_v1 = vld [vmem:[#allocation3] sm:$0xff]  ;;  %v31_v3 = vstv %s221_s2 }
   0xe   :  { %130 = vmatprep.subr.mxu0 %v184_v0  ;;  %132 = vmatprep.mubr.msk.f32.mxu0 %vm185_vm0, %v184_v0  ;;  %v28_v2 = vld [vmem:[%s220_s1] sm:$0x1]  ;;  %s186_s21 = smov [#allocation6]   ;;  %vm109_vm2 = vcmask 57344  }
   0xf   :  { %131 = vmatpush3.xpose.msk.msra.mxu0 %vm32_vm1, %v29_v1  ;;  %s117_s0 = sshll.u32 %s186_s21, 4  ;;  %s118_s0 = int_to_ptr.vmem [resolvable:$true] %s117_s0 }
  0x10   :  { %s159_s22 = scalar_lea.vmem %s118_s0, 16  ;;  %s163_s23 = scalar_lea.vmem %s118_s0, 32 }
  0x11   :  { %p160_p5 = scmp.ne.s32.totalorder %s118_s0, %s159_s22  ;;  %p164_p6 = scmp.lt.s32.totalorder %s118_s0, %s118_s0 }
  0x12   :  { %133 = vmatmul.mubr.msk.f32.vlgmr.msra.gmra.mxu0 %vm32_vm1, %v28_v2  ;;  %p165_p7 = scmp.lt.s32.totalorder %s163_s23, %s159_s22 }
  0x14   :  { %p166_p8 = por %p165_p7, %p164_p6 }
  0x16   :  { %p167_p9 = pnand %p166_p8, %p160_p5 }
  0xd2   :  { %v105_v4 = vpop.f32.mrf.mxu0 }
  0xd3   :  { %v106_v5 = vadd.f32 %v105_v4, %v31_v3 }
  0xd4   :  { %v134_v6 = vpop.f32.mrf.mxu0 }
  0xd5   :  { %110 = vst.msk [vmem:[#allocation6] sm:$0x1] %vm109_vm2, %v106_v5 }
  0xd6   :  { %170 = shalt.err (!%p167_p9)
}
  0xd7   :  { %120 = dma.vmem_to_hbm [thread:$0]  %s118_s0, 16, %s222_s3, [#allocation5]  }
  0xd8   :  { %181 = dma.done.wait [#allocation5], 16  }
  0xd9   :  { %182 = vsyncadd [#allocation5], 4294967280 }
  0xda   :  { %124 = vsyncpa [#allocation4], 1 }
  0xdb   :  { %125 = vsyncpa [#allocation5], 1 }

</bundles_post_ra>
